<compile_context>
chip_gen: v5e
topology: v5e:2x2
jax: 0.10.0
libtpu: 0.0.40
codegen_flags: <defaults>
</compile_context>

<pallas_src>
import functools

import jax
import jax.numpy as jnp
from jax.experimental import pallas as pl
from jax.experimental.pallas import tpu as pltpu

BN_EPS = 1e-5


# --------------------------------------------------------------------------- #
# Pass 1: 1x1 conv (transposed MXU output) + bias + ReLU + per-tile channel stats
# --------------------------------------------------------------------------- #
def _conv_relu_stats_kernel(x_ref, w_ref, b_ref, yt_ref, stats_ref, *,
                            tile_n, n_tokens, ragged):
    """x_ref:     (1, tile_n, C_in)      token tile (one batch element)
       w_ref:     (C_out, C_in)          1x1-conv weight, resident
       b_ref:     (C_out, 1)             conv bias (f32), resident
       yt_ref:    (1, C_out, tile_n)     transposed activations (lane-dense)
       stats_ref: (1, 1, 2, C_out)       per-tile [sum, sumsq] partials (f32)
    """
    x = x_ref[0]                                   # (tile_n, C_in)
    if x.dtype != w_ref.dtype:                     # optional bf16 MXU path
        x = x.astype(w_ref.dtype)

    # y_t = W @ x^T  -> (C_out, tile_n), f32 accumulation on the MXU.
    yt = jax.lax.dot_general(w_ref[...], x, (((1,), (1,)), ((), ())),
                             preferred_element_type=jnp.float32)
    yt = jnp.maximum(yt + b_ref[...], 0.0)         # bias + ReLU, f32, lane-dense

    # Mask padding columns of a ragged last tile out of the statistics.
    if ragged:
        col = jax.lax.broadcasted_iota(jnp.int32, yt.shape, 1)
        valid = (pl.program_id(1) * tile_n + col) < n_tokens
        yt_stat = jnp.where(valid, yt, 0.0)
    else:
        yt_stat = yt

    # Last-axis (lane) reductions -> per-channel partial sums for this tile.
    stats_ref[0, 0, 0, :] = jnp.sum(yt_stat, axis=1)
    stats_ref[0, 0, 1, :] = jnp.sum(yt_stat * yt_stat, axis=1)

    # Store transposed activations in the caller's dtype (halves HBM for bf16).
    yt_ref[0] = yt.astype(yt_ref.dtype)


# --------------------------------------------------------------------------- #
# Pass 2: per-channel affine normalization (one FMA per element)
# --------------------------------------------------------------------------- #
def _bn_apply_kernel(yt_ref, scale_ref, shift_ref, o_ref):
    y = yt_ref[0].astype(jnp.float32)              # (C_out, tile2)
    o_ref[0] = (y * scale_ref[...] + shift_ref[...]).astype(o_ref.dtype)


# --------------------------------------------------------------------------- #
# Tile / VMEM helpers
# --------------------------------------------------------------------------- #
def _vmem_budget_bytes():
    """Generation-aware scoped-VMEM budget with a conservative fallback."""
    try:
        phys = int(pltpu.get_tpu_info().vmem_capacity_bytes)
    except Exception:
        phys = 64 << 20                 # conservative: v7x per-TensorCore VMEM
    # ~55% of physical, capped so v5e/v6e stay well inside 128 MiB and v7x
    # keeps headroom for Mosaic-internal scratch inside 64 MiB.
    return max(16 << 20, min(int(phys * 0.55), 56 << 20))


def _pick_tile(n, per_row_bytes, fixed_bytes, budget,
               candidates=(2048, 1024, 512, 384, 256, 128)):
    """Largest token tile whose full footprint fits the budget.

    Returns the full extent `n` when it fits (fewest grid steps); otherwise a
    128-multiple, preferring exact divisors of n (no ragged last tile)."""
    if fixed_bytes + n * per_row_bytes <= budget:
        return n
    fitting = [t for t in candidates if fixed_bytes + t * per_row_bytes <= budget]
    if not fitting:
        return n if n <= 128 else 128   # minimal lane-aligned tile
    for t in fitting:                   # all fitting candidates are < n here
        if n % t == 0:
            return t
    return fitting[0]


# --------------------------------------------------------------------------- #
# Wrapper
# --------------------------------------------------------------------------- #
def post_layer_forward(hidden_states, conv_w, conv_b, bn_gamma, bn_beta,
                       input_h, input_w, *, mxu_dtype=None):
    """hidden_states: (b, n, hidden) -> NCHW (b, out_channels, H, W)."""
    b, n, c_in = hidden_states.shape
    assert n == input_h * input_w
    c_out = conv_w.shape[0]

    in_dtype = hidden_states.dtype
    mxu_dtype = jnp.dtype(in_dtype if mxu_dtype is None else mxu_dtype)
    yt_dtype = in_dtype                       # intermediate at caller width

    # Weight stays (C_out, C_in): the MXU then emits the transposed result
    # directly (no in-kernel transpose).  Bias as an f32 column vector.
    w = conv_w.reshape(c_out, c_in).astype(mxu_dtype)
    bias_col = conv_b.reshape(c_out, 1).astype(jnp.float32)

    budget = _vmem_budget_bytes()
    x_isz = jnp.dtype(in_dtype).itemsize
    yt_isz = jnp.dtype(yt_dtype).itemsize
    w_isz = jnp.dtype(mxu_dtype).itemsize

    # ---- Pass 1 tile: double-buffered x + y_t tiles, in-kernel f32 working
    # set, plus (conservatively double-buffered) resident weight/bias/stats. ---
    per_row1 = 2 * (c_in * x_isz + c_out * yt_isz) + 3 * c_out * 4
    fixed1 = 2 * (c_out * c_in * w_isz + c_out * 4 + 2 * c_out * 4) + (2 << 20)
    tile_n = _pick_tile(n, per_row1, fixed1, budget)
    num_t1 = pl.cdiv(n, tile_n)
    ragged1 = (n % tile_n) != 0

    kernel1 = functools.partial(_conv_relu_stats_kernel,
                                tile_n=tile_n, n_tokens=n, ragged=ragged1)

    yt, stats = pl.pallas_call(
        kernel1,
        grid=(b, num_t1),
        in_specs=[
            pl.BlockSpec((1, tile_n, c_in), lambda bi, ti: (bi, ti, 0)),
            pl.BlockSpec((c_out, c_in), lambda bi, ti: (0, 0)),     # resident W
            pl.BlockSpec((c_out, 1), lambda bi, ti: (0, 0)),        # resident b
        ],
        out_specs=[
            pl.BlockSpec((1, c_out, tile_n), lambda bi, ti: (bi, 0, ti)),
            pl.BlockSpec((1, 1, 2, c_out), lambda bi, ti: (bi, ti, 0, 0)),
        ],
        out_shape=[
            jax.ShapeDtypeStruct((b, c_out, n), yt_dtype),
            jax.ShapeDtypeStruct((b, num_t1, 2, c_out), jnp.float32),
        ],
        compiler_params=pltpu.CompilerParams(
            # No cross-step accumulators -> fully parallel (megacore on v7x).
            dimension_semantics=("parallel", "parallel"),
            vmem_limit_bytes=budget),
    )(hidden_states, w, bias_col)

    # ---- Fold per-tile partials into per-channel scale/shift (tiny math) -----
    cnt = jnp.float32(b * n)
    ch_sum = jnp.sum(stats[:, :, 0, :], axis=(0, 1))               # (C_out,)
    ch_sq = jnp.sum(stats[:, :, 1, :], axis=(0, 1))                # (C_out,)
    mean = ch_sum / cnt
    var = jnp.maximum(ch_sq / cnt - mean * mean, 0.0)              # biased, clamped
    scale = bn_gamma.astype(jnp.float32) * jax.lax.rsqrt(var + BN_EPS)
    shift = bn_beta.astype(jnp.float32) - mean * scale
    scale_col = scale.reshape(c_out, 1)
    shift_col = shift.reshape(c_out, 1)

    # ---- Pass 2: streaming FMA with its own (larger) token tile --------------
    out_isz = jnp.dtype(in_dtype).itemsize
    per_row2 = 2 * c_out * (yt_isz + out_isz) + c_out * 4
    fixed2 = 2 * (2 * c_out * 4) + (1 << 20)
    tile2 = _pick_tile(n, per_row2, fixed2, budget,
                       candidates=(8192, 4096, 2048, 1024, 512, 256, 128))
    num_t2 = pl.cdiv(n, tile2)

    out = pl.pallas_call(
        _bn_apply_kernel,
        grid=(b, num_t2),
        in_specs=[
            pl.BlockSpec((1, c_out, tile2), lambda bi, ti: (bi, 0, ti)),
            pl.BlockSpec((c_out, 1), lambda bi, ti: (0, 0)),        # resident
            pl.BlockSpec((c_out, 1), lambda bi, ti: (0, 0)),        # resident
        ],
        out_specs=pl.BlockSpec((1, c_out, tile2), lambda bi, ti: (bi, 0, ti)),
        out_shape=jax.ShapeDtypeStruct((b, c_out, n), in_dtype),
        compiler_params=pltpu.CompilerParams(
            dimension_semantics=("parallel", "parallel"),
            vmem_limit_bytes=budget),
    )(yt, scale_col, shift_col)

    # Already channel-major: reshape is free (no transpose, no extra HBM pass).
    return out.reshape(b, c_out, input_h, input_w)


# --------------------------------------------------------------------------- #
# Pure-JAX reference (same math as the PyTorch forward)
# --------------------------------------------------------------------------- #
def _reference(hidden_states, conv_w, conv_b, bn_gamma, bn_beta, input_h, input_w):
    b, n, c_in = hidden_states.shape
    c_out = conv_w.shape[0]
    x = hidden_states.reshape(b * n, c_in).astype(jnp.float32)
    w = conv_w.reshape(c_out, c_in).T.astype(jnp.float32)
    y = x @ w + conv_b[None, :].astype(jnp.float32)
    y = jnp.maximum(y, 0.0)
    mean = jnp.mean(y, axis=0, keepdims=True)
    var = jnp.mean((y - mean) ** 2, axis=0, keepdims=True)
    y = (bn_gamma[None, :] * (y - mean) / jnp.sqrt(var + BN_EPS)
         + bn_beta[None, :])
    y = y.reshape(b, n, c_out)
    return jnp.transpose(y, (0, 2, 1)).reshape(b, c_out, input_h, input_w)


if __name__ == "__main__":
    # Small config consistent with the module: n = input_h * input_w.
    batch = 2
    tf_hidden_size = 32
    tf_input_h = 4
    tf_input_w = 4
    tf_out_channels = 8
    n_tokens = tf_input_h * tf_input_w

    key = jax.random.PRNGKey(0)
    k_x, k_w, k_b = jax.random.split(key, 3)

    hidden_states = jax.random.normal(
        k_x, (batch, n_tokens, tf_hidden_size), dtype=jnp.float32)

    # Conv2d 1x1 weight shape: (C_out, C_in, 1, 1); BatchNorm2d fresh init.
    conv_w = jax.random.normal(
        k_w, (tf_out_channels, tf_hidden_size, 1, 1), dtype=jnp.float32) * 0.1
    conv_b = jax.random.normal(k_b, (tf_out_channels,), dtype=jnp.float32) * 0.1
    bn_gamma = jnp.ones((tf_out_channels,), dtype=jnp.float32)
    bn_beta = jnp.zeros((tf_out_channels,), dtype=jnp.float32)

    out = post_layer_forward(hidden_states, conv_w, conv_b, bn_gamma, bn_beta,
                             tf_input_h, tf_input_w)
    out = jax.block_until_ready(out)

    ref = _reference(hidden_states, conv_w, conv_b, bn_gamma, bn_beta,
                     tf_input_h, tf_input_w)
    assert out.shape == (batch, tf_out_channels, tf_input_h, tf_input_w)
    assert jnp.allclose(out, ref, atol=2e-2, rtol=2e-2), (
        float(jnp.max(jnp.abs(out - ref))))

    print("KERNEL_OK")
</pallas_src>

<mosaic_0001>
module attributes {stable_mosaic.version = 11 : i64} {
  func.func @_conv_relu_stats_kernel(%arg0: i32, %arg1: i32, %arg2: memref<1x16x32xf32, #tpu.memory_space<vmem>>, %arg3: memref<8x32xf32, #tpu.memory_space<vmem>>, %arg4: memref<8x1xf32, #tpu.memory_space<vmem>>, %arg5: memref<1x8x16xf32, #tpu.memory_space<vmem>>, %arg6: memref<1x1x2x8xf32, #tpu.memory_space<vmem>>) attributes {dimension_semantics = [#tpu.dimension_semantics<parallel>, #tpu.dimension_semantics<parallel>], iteration_bounds = array<i64: 2, 1>, scalar_prefetch = 0 : i64, scratch_operands = 0 : i64, tpu.core_type = #tpu.core_type<tc>, window_params = [{transform_indices = @transform_0, window_bounds = array<i64: 1, 16, 32>}, {pipeline_mode = #tpu.pipeline_mode<synchronous>, transform_indices = @transform_1, window_bounds = array<i64: 8, 32>}, {pipeline_mode = #tpu.pipeline_mode<synchronous>, transform_indices = @transform_2, window_bounds = array<i64: 8, 1>}, {transform_indices = @transform_3, window_bounds = array<i64: 1, 8, 16>}, {transform_indices = @transform_4, window_bounds = array<i64: 1, 1, 2, 8>}]} {
    %c0 = arith.constant 0 : index
    %c0_0 = arith.constant 0 : index
    %c0_1 = arith.constant 0 : index
    %0 = vector.load %arg2[%c0, %c0_0, %c0_1] : memref<1x16x32xf32, #tpu.memory_space<vmem>>, vector<1x16x32xf32>
    %1 = vector.shape_cast %0 : vector<1x16x32xf32> to vector<16x32xf32>
    %c0_2 = arith.constant 0 : index
    %c0_3 = arith.constant 0 : index
    %2 = vector.load %arg3[%c0_2, %c0_3] : memref<8x32xf32, #tpu.memory_space<vmem>>, vector<8x32xf32>
    %cst = arith.constant dense<0.000000e+00> : vector<8x16xf32>
    %3 = tpu.matmul %2, %1, %cst {dimension_numbers = #tpu.dot_dimension_numbers<[1], [1], [0], [0], [0, 0, 1, 0], [], []>} : vector<8x32xf32>, vector<16x32xf32>, vector<8x16xf32> -> vector<8x16xf32>
    %c0_4 = arith.constant 0 : index
    %c0_5 = arith.constant 0 : index
    %4 = vector.load %arg4[%c0_4, %c0_5] : memref<8x1xf32, #tpu.memory_space<vmem>>, vector<8x1xf32>
    %5 = vector.broadcast %4 : vector<8x1xf32> to vector<8x16xf32>
    %6 = arith.addf %3, %5 : vector<8x16xf32>
    %cst_6 = arith.constant 0.000000e+00 : f32
    %7 = vector.broadcast %cst_6 : f32 to vector<8x16xf32>
    %8 = arith.maximumf %6, %7 : vector<8x16xf32>
    %cst_7 = arith.constant dense<0.000000e+00> : vector<8xf32>
    %9 = vector.multi_reduction <add>, %8, %cst_7 [1] : vector<8x16xf32> to vector<8xf32>
    %c0_8 = arith.constant 0 : index
    %c0_9 = arith.constant 0 : index
    %c0_10 = arith.constant 0 : index
    %c0_11 = arith.constant 0 : index
    %10 = vector.load %arg6[%c0_8, %c0_9, %c0_10, %c0_11] : memref<1x1x2x8xf32, #tpu.memory_space<vmem>>, vector<1x1x1x8xf32>
    %11 = vector.shape_cast %10 : vector<1x1x1x8xf32> to vector<8xf32>
    %12 = vector.shape_cast %9 : vector<8xf32> to vector<1x1x1x8xf32>
    tpu.vector_store %arg6[%c0_8, %c0_9, %c0_10, %c0_11], %12 {strides = array<i32>} : memref<1x1x2x8xf32, #tpu.memory_space<vmem>>, vector<1x1x1x8xf32>,
    %13 = arith.mulf %8, %8 : vector<8x16xf32>
    %cst_12 = arith.constant dense<0.000000e+00> : vector<8xf32>
    %14 = vector.multi_reduction <add>, %13, %cst_12 [1] : vector<8x16xf32> to vector<8xf32>
    %c0_13 = arith.constant 0 : index
    %c0_14 = arith.constant 0 : index
    %c1 = arith.constant 1 : index
    %c0_15 = arith.constant 0 : index
    %15 = vector.load %arg6[%c0_13, %c0_14, %c1, %c0_15] : memref<1x1x2x8xf32, #tpu.memory_space<vmem>>, vector<1x1x1x8xf32>
    %16 = vector.shape_cast %15 : vector<1x1x1x8xf32> to vector<8xf32>
    %17 = vector.shape_cast %14 : vector<8xf32> to vector<1x1x1x8xf32>
    tpu.vector_store %arg6[%c0_13, %c0_14, %c1, %c0_15], %17 {strides = array<i32>} : memref<1x1x2x8xf32, #tpu.memory_space<vmem>>, vector<1x1x1x8xf32>,
    %c0_16 = arith.constant 0 : index
    %c0_17 = arith.constant 0 : index
    %c0_18 = arith.constant 0 : index
    %18 = vector.load %arg5[%c0_16, %c0_17, %c0_18] : memref<1x8x16xf32, #tpu.memory_space<vmem>>, vector<1x8x16xf32>
    %19 = vector.shape_cast %18 : vector<1x8x16xf32> to vector<8x16xf32>
    %20 = vector.shape_cast %8 : vector<8x16xf32> to vector<1x8x16xf32>
    tpu.vector_store %arg5[%c0_16, %c0_17, %c0_18], %20 {strides = array<i32>} : memref<1x8x16xf32, #tpu.memory_space<vmem>>, vector<1x8x16xf32>,
    return
  }
  func.func @transform_0(%arg0: i32, %arg1: i32) -> (i32, i32, i32) {
    %c0_i32 = arith.constant 0 : i32
    %c0_i32_0 = arith.constant 0 : i32
    return %arg0, %arg1, %c0_i32 : i32, i32, i32
  }
  func.func @transform_1(%arg0: i32, %arg1: i32) -> (i32, i32) {
    %c0_i32 = arith.constant 0 : i32
    %c0_i32_0 = arith.constant 0 : i32
    %c0_i32_1 = arith.constant 0 : i32
    return %c0_i32, %c0_i32_0 : i32, i32
  }
  func.func @transform_2(%arg0: i32, %arg1: i32) -> (i32, i32) {
    %c0_i32 = arith.constant 0 : i32
    %c0_i32_0 = arith.constant 0 : i32
    %c0_i32_1 = arith.constant 0 : i32
    return %c0_i32, %c0_i32_0 : i32, i32
  }
  func.func @transform_3(%arg0: i32, %arg1: i32) -> (i32, i32, i32) {
    %c0_i32 = arith.constant 0 : i32
    %c0_i32_0 = arith.constant 0 : i32
    return %arg0, %c0_i32, %arg1 : i32, i32, i32
  }
  func.func @transform_4(%arg0: i32, %arg1: i32) -> (i32, i32, i32, i32) {
    %c0_i32 = arith.constant 0 : i32
    %c0_i32_0 = arith.constant 0 : i32
    %c0_i32_1 = arith.constant 0 : i32
    return %arg0, %arg1, %c0_i32, %c0_i32_0 : i32, i32, i32, i32
  }
}

</mosaic_0001>

<bundles_post_ra>
// kernel: tpu_custom_call.1
= control target key start
LH: loop header
LB: loop body
LE: loop exit
PB: predicated region body
PF: predicated region fallthrough
CT: control target
= control target key end

     0   :  { %10 = vsyncpa [#allocation3], 0  ;;  %s875_s0 = inlined_call_operand.hbm [shape: f32[2,16,32], index: 0, kind: input, shape index: {}]   ;;  %s876_s1 = inlined_call_operand.vmem [shape: f32[8,32], index: 1, kind: input, shape index: {}]   ;;  %s877_s2 = inlined_call_operand.vmem [shape: f32[8,1], index: 2, kind: input, shape index: {}]   ;;  %s878_s3 = inlined_call_operand.hbm [shape: f32[2,8,16], index: 3, kind: output, shape index: {0}]   ;;  %s879_s4 = inlined_call_operand.hbm [shape: f32[2,1,2,8], index: 4, kind: output, shape index: {1}]  }
   0x1   :  { %12 = vsyncpa [#allocation3 + $0x1], 0 }
   0x2   :  { %13 = vsyncpa [#allocation4], 0 }
   0x3   :  { %15 = vsyncpa [#allocation4 + $0x1], 0 }
   0x4   :  { %16 = vsyncpa [#allocation7], 0 }
   0x5   :  { %18 = vsyncpa [#allocation7 + $0x1], 0  ;;  %s729_s15 = smov 0   ;;  %s731_s16 = smov 0  }
   0x6   :  { %s733_s17 = smov 0   ;;  %s735_s18 = smov 0  }
   0x7   :  { %s737_s19 = smov 0   ;;  %s739_s20 = smov 0  }
   0x8 LB: > { %s463_s21 = sadd.s32 4294967295, %s699_s20   ;;  %s464_s22 = sadd.s32 4294967294, %s699_s20   ;;  %s699_s20 = sphi %s739_s20, %s24_s20   ;;  %s695_s19 = sphi %s737_s19, %s888_s19   ;;  %s691_s18 = sphi %s735_s18, %s887_s18   ;;  %s687_s17 = sphi %s733_s17, %s886_s17   ;;  %s683_s16 = sphi %s731_s16, %s885_s16   ;;  %s679_s15 = sphi %s729_s15, %s884_s15  }
   0x9   : > { %s36_s23 = sadd.s32 1, %s695_s19  ;;  %s45_s24 = sadd.s32 1, %s687_s17 }
   0xa   : > { %p38_p0 = scmp.ge.s32.totalorder %s36_s23, 2  ;;  %p52_p1 = scmp.ne.s32.totalorder %s687_s17, %s683_s16 }
   0xb   : > { %p53_p2 = scmp.eq.s32.totalorder %s699_s20, 0  ;;  %p58_p3 = scmp.ne.s32.totalorder %s683_s16, %s679_s15 }
   0xc   : > { %s890_s23 = smov (%p38_p0, %s36_s23), 0  ;;  %p59_p5 = scmp.eq.s32.totalorder %s463_s21, 0 }
   0xd   : > { %p770_p4 = por %p53_p2, %p52_p1  ;;  %s40_s26 = ssub.s32 %s695_s19, %s890_s23 }
   0xe   : > { %p126_p6 = scmp.eq.s32.totalorder %s463_s21, 1  ;;  %p43_p7 = scmp.eq.s32.totalorder %s40_s26, 0 }
   0xf   : > { %p776_p8 = por %p59_p5, %p58_p3  ;;  %p132_p10 = scmp.eq.s32.totalorder %s464_s22, 1 }
  0x10   : > { %p780_p9 = por %p126_p6, %p52_p1  ;;  %p466_p12 = scmp.ge.s32.totalorder %s699_s20, 2 }
  0x11   : > { %s785_s29 = scalar_select %p43_p7, %s687_s17, %s45_s24  }
  0x12   : > { %p787_p11 = por %p132_p10, %p58_p3  ;;  %p501_p13 = scmp.lt.s32.totalorder %s699_s20, 2 }
  0x13   : > { %s186_s5 = sand.u32 1, %s687_s17   ;;  %s483_s7 = sshll.u32 %s695_s19, 4 }
  0x14   : > { %s467_s6 = sshll.u32 %s186_s5, 4  ;;  %s197_s10 = scalar_lea.hbm %s875_s0, %s483_s7 }
  0x15   : > { %s190_s11 = scalar_lea.vmem [#allocation2], %s467_s6  ;;  %s198_s13 = sshll.u32 %s197_s10, 4  ;;  %s199_s13 = int_to_ptr.hbm [resolvable:$true] %s198_s13 }
  0x16   : > { %s200_s12 = sshll.u32 %s190_s11, 4  ;;  %p491_p0 = pnand %p501_p13, %p770_p4  ;;  %s201_s12 = int_to_ptr.vmem [resolvable:$true] %s200_s12 }
  0x17   : > { %p470_p1 = scmp.ge.s32.totalorder %s699_s20, 1  ;;  %s187_s14 = scalar_lea.sflag [#allocation3], %s186_s5 }
  0x18   : > { %s701_s21 = smov 128   ;;  %s702_s22 = smov 8  }
  0x19   : > { %493 = dma.hbm_to_vmem [thread:$0]  (!%p491_p0), %s199_s13, 256, %s201_s12, %s187_s14, %s701_s21, %s701_s21, %s702_s22  }
  0x1a   : > { %p208_p2 = scmp.lt.s32.totalorder %s699_s20, 3 }
  0x1c   : > { %p209_p3 = pnand %p470_p1, %p208_p2 }
  0x1d   : > { %s803_s24 = sand.u32 (!%p209_p3), 1, %s683_s16  }
  0x1e   : > { %212 = sbr.rel (%p209_p3) target bundleno = 299 (0x12b), region = 32  ;;  %s471_s26 = sshll.u32 (!%p209_p3), %s803_s24, 4 }
  0x1f   : > { %s215_s6 = scalar_lea.sflag (!%p209_p3), [#allocation3], %s803_s24  ;;  %s218_s7 = scalar_lea.vmem (!%p209_p3), [#allocation2], %s471_s26 }
  0x23   : > { %666 = dma.done.wait (%p776_p8), %s215_s6, 256  }
  0x24   : > { %668 = vsyncadd (%p776_p8), %s215_s6, 4294967040  ;;  %v703_v0 = vmov 0   ;;  %vm259_vm0 = vcmask 261120   ;;  %v251_v1 = vld [vmem:[%s218_s7 + $0x8] sm:$0xff]  ;;  %v253_v2 = vld [vmem:[%s877_s2] sm:$0xff]  ;;  %s479_s27 = sshll.u32 %s691_s18, 3 }
  0x25   : > { %554 = vset.pattern.permute.xlu0 %v703_v0  ;;  %474 = vmatpush.xpose.msk.msra.mxu0 %vm259_vm0, %v251_v1  ;;  %v250_v3 = vld [vmem:[%s218_s7] sm:$0xff]  ;;  %s472_s10 = sshll.u32 %s803_s24, 3  ;;  %s327_s13 = scalar_lea.hbm %s878_s3, %s479_s27  ;;  %vm290_vm1 = vcmask 130048  }
  0x26   : > { %256 = vperm.xlu0 %554, %v253_v2   ;;  %v252_v4 = vld [vmem:[%s876_s1] sm:$0xff]  ;;  %s241_s14 = scalar_lea.vmem [#allocation5], %s472_s10  ;;  %s331_s22 = sshll.u32 %s327_s13, 4  ;;  %s332_s22 = int_to_ptr.hbm [resolvable:$true] %s331_s22 }
  0x27   : > { %s329_s21 = sshll.u32 %s241_s14, 4  ;;  %s311_s26 = scalar_lea.sflag [#allocation4], %s803_s24  ;;  %s330_s21 = int_to_ptr.vmem [resolvable:$true] %s329_s21 }
  0x28   : > { %s599_s6 = sshra.s32 %s332_s22, 4  ;;  %s605_s8 = scalar_lea.hbm %s878_s3, 16  ;;  %s600_s6 = int_to_ptr.hbm [resolvable:$true] %s599_s6 }
  0x29   : > { %475 = vmatpush.xpose.msk.msra.mxu0 %vm259_vm0, %v250_v3  ;;  %s601_s7 = scalar_lea.hbm %s600_s6, 8  ;;  %p606_p7 = scmp.lt.s32.totalorder %s600_s6, %s878_s3 }
  0x2a   : > { %p602_p4 = scmp.ne.s32.totalorder %s600_s6, %s601_s7  ;;  %p607_p8 = scmp.lt.s32.totalorder %s605_s8, %s601_s7 }
  0x2c   : > { %476 = vmatmul.msk.f32.vlgmr.msra.gmra.mxu0 %vm259_vm0, %v252_v4  ;;  %p603_p5 = pnand %p602_p4, %p780_p9  ;;  %p608_p10 = por %p607_p8, %p606_p7 }
  0x2e   : > { %p604_p6 = pneg %p603_p5 }
  0x30   : > { %p609_p13 = pnand %p608_p10, %p604_p6 }
  0x98   : > { %v257_v5 = vpop.permute.xlu0 %256 }
  0xa9   : > { %v286_v6 = vpop.f32.mrf.mxu0 }
  0xaa   : > { %v287_v7 = vadd.f32 %v286_v6, %v257_v5 }
  0xac   : > { %v289_v8 = vmax.f32 %v287_v7, 0.0 }
  0xae   : > { %v291_v9 = vsel %vm290_vm1, %v289_v8, 0.0  ;;  %v301_v10 = vmul.f32 %v289_v8, %v289_v8  ;;  %309 = vst.msk [vmem:[%s241_s14] sm:$0xff] %vm290_vm1, %v289_v8 }
  0xaf   : > { %292 = vadd.xlane.f32.xlu0 %v291_v9 }
  0xb0   : > { %612 = shalt.err (!%p609_p13)
}
  0xb1   : > { %486 = dma.vmem_to_hbm [thread:$0]  (%p780_p9), %s330_s21, 128, %s332_s22, %s311_s26   ;;  %v302_v11 = vsel %vm290_vm1, %v301_v10, 0.0  ;;  %v295_v12 = vlaneseq  ;;  %vm299_vm2 = vcmask 57344  }
  0xb2   : > { %303 = vadd.xlane.f32.xlu1 %v302_v11  ;;  %s473_s10 = sshll.u32 %s803_s24, 1  ;;  %s480_s11 = sshll.u32 %s691_s18, 1 }
  0xb3   : > { %v296_v13 = vand.u32 127, %v295_v12  ;;  %s342_s14 = scalar_lea.hbm %s879_s4, %s480_s11  ;;  %s248_s6 = scalar_lea.vmem [#allocation6], %s473_s10 }
  0xb4   : > { %s344_s7 = sshll.u32 %s248_s6, 4  ;;  %s346_s25 = sshll.u32 %s342_s14, 4  ;;  %s345_s7 = int_to_ptr.vmem [resolvable:$true] %s344_s7  ;;  %s347_s25 = int_to_ptr.hbm [resolvable:$true] %s346_s25 }
  0xb5   : > { %s316_s21 = scalar_lea.sflag [#allocation7], %s803_s24  ;;  %s627_s18 = sshra.s32 %s347_s25, 4  ;;  %s628_s18 = int_to_ptr.hbm [resolvable:$true] %s627_s18 }
  0xb6   : > { %s629_s22 = scalar_lea.hbm %s628_s18, 2  ;;  %s633_s8 = scalar_lea.hbm %s879_s4, 4 }
  0xb7   : > { %p630_p0 = scmp.ne.s32.totalorder %s628_s18, %s629_s22  ;;  %p634_p3 = scmp.lt.s32.totalorder %s628_s18, %s879_s4 }
  0xb8   : > { %p635_p4 = scmp.lt.s32.totalorder %s633_s8, %s629_s22 }
  0xb9   : > { %p631_p1 = pnand %p630_p0, %p780_p9 }
  0xba   : > { %p636_p5 = por %p635_p4, %p634_p3 }
  0xbb   : > { %p632_p2 = pneg %p631_p1 }
  0xbd   : > { %p637_p6 = pnand %p636_p5, %p632_p2 }
 0x122   : > { %v293_v14 = vpop.xlane.xlu0 %292 }
 0x123   : > { %v297_v15 = vperm.slane %v293_v14, %v296_v13 }
 0x125   : > { %v304_v16 = vpop.xlane.xlu1 %303  ;;  %300 = vst.msk [vmem:[%s248_s6] sm:$0x1] %vm299_vm2, %v297_v15 }
 0x126   : > { %v306_v17 = vperm.slane %v304_v16, %v296_v13 }
 0x128   : > { %308 = vst.msk [vmem:[%s248_s6 + $0x1] sm:$0x1] %vm299_vm2, %v306_v17 }
 0x129   : > { %640 = shalt.err (!%p637_p6)
}
 0x12a   : > { %487 = dma.vmem_to_hbm [thread:$0]  (%p780_p9), %s345_s7, 32, %s347_s25, %s316_s21  }
 0x12b PF: > { %s358_s24 = sand.u32 1, %s679_s15   ;;  %p495_p7 = pnand %p466_p12, %p787_p11 }
 0x12c   : > { %s359_s10 = scalar_lea.sflag [#allocation4], %s358_s24 }
 0x12d   : > { %p496_p8 = pneg %p495_p7 }
 0x12f   : > { %670 = dma.done.wait (%p496_p8), %s359_s10, 128  }
 0x130   : > { %672 = vsyncadd (%p496_p8), %s359_s10, 4294967168  ;;  %s369_s11 = scalar_lea.sflag [#allocation7], %s358_s24 }
 0x131   : > { %674 = dma.done.wait (%p496_p8), %s369_s11, 32  }
 0x132   : > { %676 = vsyncadd (%p496_p8), %s369_s11, 4294967264  ;;  %s24_s20 = sadd.s32 1, %s699_s20   ;;  %s884_s15 = smov %s683_s16 }
 0x133   : > { %p21_p10 = scmp.ge.s32.totalorder %s24_s20, 4   ;;  %s885_s16 = smov %s687_s17 }
 0x134   : > { %s886_s17 = smov %s785_s29  ;;  %s887_s18 = smov %s695_s19 }
 0x135   : > { %s888_s19 = smov %s890_s23  ;;  %23 = sbr.rel (!%p21_p10) target bundleno = 8 (0x8), region = 94 }
 0x13a   :  { %375 = vsyncpa [#allocation3], 1 }
 0x13b   :  { %377 = vsyncpa [#allocation3 + $0x1], 1 }
 0x13c   :  { %378 = vsyncpa [#allocation4], 1 }
 0x13d   :  { %380 = vsyncpa [#allocation4 + $0x1], 1 }
 0x13e   :  { %381 = vsyncpa [#allocation7], 1 }
 0x13f   :  { %383 = vsyncpa [#allocation7 + $0x1], 1 }

</bundles_post_ra>
